<compile_context>
chip_gen: v7x
topology: tpu7x:2x2x1
jax: 0.10.0
libtpu: 0.0.40
codegen_flags: <defaults>
</compile_context>

<pallas_src>
import jax
import jax.numpy as jnp
from jax.experimental import pallas as pl
from jax.experimental.pallas import tpu as pltpu


def _gnn_fused_kernel(a_ref, x0_ref, agge_ref, w1e_ref, w1x_ref, b1_ref,
                      w2_ref, b2_ref, out_ref, h_ref):
    """One grid step == one GINConv layer.

    h_ref (bf16 VMEM scratch) carries the node features across layers.
    out_ref has a constant output block index so it stays resident in VMEM;
    the store is additionally gated to the last layer (robust + no dead vst).
    """
    layer = pl.program_id(0)
    last = pl.num_programs(0) - 1

    @pl.when(layer == 0)
    def _():
        h_ref[...] = x0_ref[...]

    # Neighbor + self-loop aggregation of node features on the MXU: A @ h.
    agg_x = jnp.dot(a_ref[...], h_ref[...],
                    preferred_element_type=jnp.float32)

    # MLP layer 1: ReLU(agg_x @ W1x + agg_e @ W1e + b1).
    # agg_e is layer-invariant and resident in VMEM; its (N,D)x(D,2E) matmul is
    # essentially free under MXU slack (nn.Dropout(0.2) is identity in eval).
    edge_term = jnp.dot(agge_ref[...], w1e_ref[...],
                        preferred_element_type=jnp.float32)
    hidden = (jnp.dot(agg_x.astype(jnp.bfloat16), w1x_ref[...],
                      preferred_element_type=jnp.float32)
              + edge_term + b1_ref[...])
    hidden = jnp.maximum(hidden, 0.0)

    # MLP layer 2.
    out = jnp.dot(hidden.astype(jnp.bfloat16), w2_ref[...],
                  preferred_element_type=jnp.float32) + b2_ref[...]

    # JK='last': only the final layer's value reaches HBM (no inter-layer ReLU
    # on the last layer, per GNN.forward).
    @pl.when(layer == last)
    def _():
        out_ref[...] = out

    # Inter-layer F.relu feeds the next layer; F.dropout is identity (eval).
    @pl.when(layer < last)
    def _():
        h_ref[...] = jnp.maximum(out, 0.0).astype(h_ref.dtype)


def gnn_pallas(A, x0, agg_e, W1E, W1X, B1, W2, B2):
    L, Ed, two_emb = W1E.shape
    N, D = x0.shape
    G = W2.shape[2]
    assert D == G, "node_dim must equal graph_width for layer chaining"

    # Layer-invariant tiles: constant index_map -> single-buffer them.
    inv = dict(pipeline_mode=pl.Buffered(1))

    return pl.pallas_call(
        _gnn_fused_kernel,
        out_shape=jax.ShapeDtypeStruct((N, G), jnp.float32),
        grid_spec=pltpu.PrefetchScalarGridSpec(
            num_scalar_prefetch=0,
            grid=(L,),                                                   # layer loop
            in_specs=[
                pl.BlockSpec((N, N), lambda l: (0, 0), **inv),           # A
                pl.BlockSpec((N, D), lambda l: (0, 0), **inv),           # x0
                pl.BlockSpec((N, Ed), lambda l: (0, 0), **inv),          # agg_e
                pl.BlockSpec((None, Ed, two_emb), lambda l: (l, 0, 0)),  # W1e[l]
                pl.BlockSpec((None, D, two_emb), lambda l: (l, 0, 0)),   # W1x[l]
                pl.BlockSpec((None, 1, two_emb), lambda l: (l, 0, 0)),   # b1[l]
                pl.BlockSpec((None, two_emb, G), lambda l: (l, 0, 0)),   # W2[l]
                pl.BlockSpec((None, 1, G), lambda l: (l, 0, 0)),         # b2[l]
            ],
            out_specs=pl.BlockSpec((N, G), lambda l: (0, 0)),
            scratch_shapes=[pltpu.VMEM((N, D), jnp.bfloat16)],           # resident h
        ),
        compiler_params=pltpu.CompilerParams(
            # Layers are sequentially dependent (h carried in scratch).  For
            # large N / graph batches add a leading 'parallel' axis (v7x: 2 TCs).
            dimension_semantics=("arbitrary",),
            # Conservative on all gens (<= half of v7x's 64 MiB physical VMEM);
            # re-derive when tiling A for large N.
            vmem_limit_bytes=32 * 1024 * 1024,
        ),
    )(A, x0, agg_e, W1E, W1X, B1, W2, B2)


def gnn_forward(x, edge_index, edge_attr, layer_params, *, JK="last"):
    """Equivalent of GNN.forward in eval mode (drop_ratio=0, JK='last')."""
    if JK != "last":
        # TODO(synk): JK='sum' branch of the reference (which oddly indexes
        # [0]) is not implemented; the default JK='last' is reproduced.
        raise NotImplementedError(JK)

    N, node_dim = x.shape
    edge_dim = edge_attr.shape[1]
    graph_width = layer_params[0][3].shape[1]
    # Same consistency constraints as the PyTorch Linear(2*node_dim, ...).
    assert edge_dim == node_dim and graph_width == node_dim

    src, dst = edge_index[0], edge_index[1]

    # add_self_loops + self-loop edge attributes (last column = 1).
    loop = jnp.arange(N, dtype=src.dtype)
    src_full = jnp.concatenate([src, loop], axis=0)
    dst_full = jnp.concatenate([dst, loop], axis=0)
    self_loop_attr = jnp.zeros((N, edge_dim), x.dtype).at[:, edge_dim - 1].set(1.0)
    edge_attr_full = jnp.concatenate([edge_attr, self_loop_attr], axis=0)

    # ---- Layer-invariant precompute (hoisted out of the layer loop) ----
    # agg_e[d] = sum_{e: dst(e)=d} edge_attr[e]  (stays resident in VMEM, bf16)
    agg_e = jax.ops.segment_sum(edge_attr_full, dst_full, num_segments=N)
    # Dense adjacency A[d, s] = #edges s->d (incl. self loop): gather + scatter
    # add of source features becomes a single A @ h MXU matmul in the kernel.
    # NOTE: bf16 A is exact for integer edge multiplicities up to 256.
    A = jnp.zeros((N, N), jnp.float32).at[dst_full, src_full].add(1.0)

    # Stack per-layer weights for the fused (grid-over-layers) kernel.
    W1E = jnp.stack([p[0] for p in layer_params])   # (L, edge_dim, 2*emb)
    W1X = jnp.stack([p[1] for p in layer_params])   # (L, node_dim, 2*emb)
    B1 = jnp.stack([p[2] for p in layer_params])    # (L, 1, 2*emb), f32
    W2 = jnp.stack([p[3] for p in layer_params])    # (L, 2*emb, graph_width)
    B2 = jnp.stack([p[4] for p in layer_params])    # (L, 1, graph_width), f32

    # bf16 matmul operands (f32 accumulation in-kernel); A holds small integer
    # counts, so its bf16 cast is exact.
    return gnn_pallas(A.astype(jnp.bfloat16), x.astype(jnp.bfloat16),
                      agg_e.astype(jnp.bfloat16), W1E.astype(jnp.bfloat16),
                      W1X.astype(jnp.bfloat16), B1, W2.astype(jnp.bfloat16), B2)


def _ref_forward(x, edge_index, edge_attr, layer_params):
    """Pure-JAX f32 reference of the same forward pass (for verification)."""
    num_layer = len(layer_params)
    N = x.shape[0]
    edge_dim = edge_attr.shape[1]
    src, dst = edge_index[0], edge_index[1]
    loop = jnp.arange(N, dtype=src.dtype)
    src_full = jnp.concatenate([src, loop], axis=0)
    dst_full = jnp.concatenate([dst, loop], axis=0)
    self_loop_attr = jnp.zeros((N, edge_dim), x.dtype).at[:, edge_dim - 1].set(1.0)
    edge_attr_full = jnp.concatenate([edge_attr, self_loop_attr], axis=0)

    h = x
    for layer in range(num_layer):
        msg = jnp.concatenate([edge_attr_full, h[src_full]], axis=1)
        aggr = jax.ops.segment_sum(msg, dst_full, num_segments=N)
        w1e, w1x, b1, w2, b2 = layer_params[layer]
        w1 = jnp.concatenate([w1e, w1x], axis=0)
        hh = jnp.maximum(aggr @ w1 + b1, 0.0)
        out = hh @ w2 + b2
        if layer != num_layer - 1:
            out = jnp.maximum(out, 0.0)
        h = out
    return h


def init_params(key, num_layer, node_dim, edge_dim, emb_dim, graph_width):
    """Deterministic synthetic parameters (Linear weights stored as (in, out))."""
    params = []
    for _ in range(num_layer):
        key, k1, k2, k3, k4 = jax.random.split(key, 5)
        # Linear(2*node_dim, 2*emb_dim); input = [edge_attr(edge_dim) | x_j(node_dim)]
        w1e = 0.1 * jax.random.normal(k1, (edge_dim, 2 * emb_dim), jnp.float32)
        w1x = 0.1 * jax.random.normal(k2, (node_dim, 2 * emb_dim), jnp.float32)
        b1 = 0.05 * jax.random.normal(k3, (1, 2 * emb_dim), jnp.float32)
        # Linear(2*emb_dim, graph_width)
        w2 = 0.1 * jax.random.normal(k4, (2 * emb_dim, graph_width), jnp.float32)
        key, k5 = jax.random.split(key)
        b2 = 0.05 * jax.random.normal(k5, (1, graph_width), jnp.float32)
        params.append((w1e, w1x, b1, w2, b2))
    return params


if __name__ == "__main__":
    # Feature dims chosen lane-dense (128) so every matmul / store fills full
    # (8,128) vregs; dims satisfy edge_dim == node_dim == graph_width, the same
    # constraint the PyTorch module needs for its Linear(2*node_dim, ...) to be
    # consistent across layers.  (For v6e/v7x MXU fill, batch graphs or use
    # N>=256 in production; kept small here per the demo contract.)
    N = 128           # number of nodes
    E = 512           # number of edges (before self loops)
    node_dim = edge_dim = emb_dim = graph_width = 128
    num_layer = 3

    key = jax.random.PRNGKey(0)
    key, kx, ks, kd, ke, kp = jax.random.split(key, 6)
    x = jax.random.normal(kx, (N, node_dim), jnp.float32)
    src = jax.random.randint(ks, (E,), 0, N, jnp.int32)
    dst = jax.random.randint(kd, (E,), 0, N, jnp.int32)
    edge_index = jnp.stack([src, dst], axis=0)          # (2, E)
    edge_attr = jax.random.normal(ke, (E, edge_dim), jnp.float32)

    layer_params = init_params(kp, num_layer, node_dim, edge_dim, emb_dim,
                               graph_width)

    out = gnn_forward(x, edge_index, edge_attr, layer_params, JK="last")
    out = jax.block_until_ready(out)

    ref = _ref_forward(x, edge_index, edge_attr, layer_params)
    assert out.shape == (N, graph_width)
    # The kernel uses bf16 matmul operands with f32 accumulation, so compare
    # against the pure-f32 reference with scale-aware (relative) tolerances.
    abs_err = float(jnp.max(jnp.abs(out - ref)))
    scale = float(jnp.max(jnp.abs(ref)))
    rel_fro = float(jnp.linalg.norm(out - ref) / jnp.linalg.norm(ref))
    assert rel_fro < 3e-2 and abs_err < 5e-2 * scale + 1e-5, (
        rel_fro, abs_err, scale)

    print("KERNEL_OK")
</pallas_src>

<mosaic_0001>
module attributes {stable_mosaic.version = 11 : i64} {
  func.func @_gnn_fused_kernel(%arg0: i32, %arg1: memref<128x128xbf16, #tpu.memory_space<vmem>>, %arg2: memref<128x128xbf16, #tpu.memory_space<vmem>>, %arg3: memref<128x128xbf16, #tpu.memory_space<vmem>>, %arg4: memref<1x128x256xbf16, #tpu.memory_space<vmem>>, %arg5: memref<1x128x256xbf16, #tpu.memory_space<vmem>>, %arg6: memref<1x1x256xf32, #tpu.memory_space<vmem>>, %arg7: memref<1x256x128xbf16, #tpu.memory_space<vmem>>, %arg8: memref<1x1x128xf32, #tpu.memory_space<vmem>>, %arg9: memref<128x128xf32, #tpu.memory_space<vmem>>, %arg10: memref<128x128xbf16, #tpu.memory_space<vmem>>) attributes {dimension_semantics = [#tpu.dimension_semantics<arbitrary>], iteration_bounds = array<i64: 3>, scalar_prefetch = 0 : i64, scratch_operands = 1 : i64, tpu.core_type = #tpu.core_type<tc>, window_params = [{pipeline_mode = #tpu.pipeline_mode<synchronous>, transform_indices = @transform_0, window_bounds = array<i64: 128, 128>}, {pipeline_mode = #tpu.pipeline_mode<synchronous>, transform_indices = @transform_1, window_bounds = array<i64: 128, 128>}, {pipeline_mode = #tpu.pipeline_mode<synchronous>, transform_indices = @transform_2, window_bounds = array<i64: 128, 128>}, {transform_indices = @transform_3, window_bounds = array<i64: 1, 128, 256>}, {transform_indices = @transform_4, window_bounds = array<i64: 1, 128, 256>}, {transform_indices = @transform_5, window_bounds = array<i64: 1, 1, 256>}, {transform_indices = @transform_6, window_bounds = array<i64: 1, 256, 128>}, {transform_indices = @transform_7, window_bounds = array<i64: 1, 1, 128>}, {pipeline_mode = #tpu.pipeline_mode<synchronous>, transform_indices = @transform_8, window_bounds = array<i64: 128, 128>}]} {
    %c0_i32 = arith.constant 0 : i32
    %0 = arith.cmpi eq, %arg0, %c0_i32 : i32
    %1 = arith.extui %0 : i1 to i32
    %c0_i32_0 = arith.constant 0 : i32
    %2 = arith.cmpi ne, %1, %c0_i32_0 : i32
    scf.if %2 {
      %c0_28 = arith.constant 0 : index
      %c0_29 = arith.constant 0 : index
      %35 = vector.load %arg2[%c0_28, %c0_29] : memref<128x128xbf16, #tpu.memory_space<vmem>>, vector<128x128xbf16>
      %c0_30 = arith.constant 0 : index
      %c0_31 = arith.constant 0 : index
      %36 = vector.load %arg10[%c0_30, %c0_31] : memref<128x128xbf16, #tpu.memory_space<vmem>>, vector<128x128xbf16>
      tpu.vector_store %arg10[%c0_30, %c0_31], %35 {strides = array<i32>} : memref<128x128xbf16, #tpu.memory_space<vmem>>, vector<128x128xbf16>,
    } else {
    }
    %c0 = arith.constant 0 : index
    %c0_1 = arith.constant 0 : index
    %3 = vector.load %arg1[%c0, %c0_1] : memref<128x128xbf16, #tpu.memory_space<vmem>>, vector<128x128xbf16>
    %c0_2 = arith.constant 0 : index
    %c0_3 = arith.constant 0 : index
    %4 = vector.load %arg10[%c0_2, %c0_3] : memref<128x128xbf16, #tpu.memory_space<vmem>>, vector<128x128xbf16>
    %cst = arith.constant dense<0.000000e+00> : vector<128x128xf32>
    %5 = tpu.matmul %3, %4, %cst {dimension_numbers = #tpu.dot_dimension_numbers<[1], [0], [0], [1], [0, 0, 1, 1], [], []>} : vector<128x128xbf16>, vector<128x128xbf16>, vector<128x128xf32> -> vector<128x128xf32>
    %c0_4 = arith.constant 0 : index
    %c0_5 = arith.constant 0 : index
    %6 = vector.load %arg3[%c0_4, %c0_5] : memref<128x128xbf16, #tpu.memory_space<vmem>>, vector<128x128xbf16>
    %c0_6 = arith.constant 0 : index
    %c0_7 = arith.constant 0 : index
    %c0_8 = arith.constant 0 : index
    %7 = vector.load %arg4[%c0_6, %c0_7, %c0_8] : memref<1x128x256xbf16, #tpu.memory_space<vmem>>, vector<1x128x256xbf16>
    %8 = vector.shape_cast %7 : vector<1x128x256xbf16> to vector<128x256xbf16>
    %cst_9 = arith.constant dense<0.000000e+00> : vector<128x256xf32>
    %9 = tpu.matmul %6, %8, %cst_9 {dimension_numbers = #tpu.dot_dimension_numbers<[1], [0], [0], [1], [0, 0, 1, 1], [], []>} : vector<128x128xbf16>, vector<128x256xbf16>, vector<128x256xf32> -> vector<128x256xf32>
    %10 = arith.truncf %5 : vector<128x128xf32> to vector<128x128xbf16>
    %c0_10 = arith.constant 0 : index
    %c0_11 = arith.constant 0 : index
    %c0_12 = arith.constant 0 : index
    %11 = vector.load %arg5[%c0_10, %c0_11, %c0_12] : memref<1x128x256xbf16, #tpu.memory_space<vmem>>, vector<1x128x256xbf16>
    %12 = vector.shape_cast %11 : vector<1x128x256xbf16> to vector<128x256xbf16>
    %cst_13 = arith.constant dense<0.000000e+00> : vector<128x256xf32>
    %13 = tpu.matmul %10, %12, %cst_13 {dimension_numbers = #tpu.dot_dimension_numbers<[1], [0], [0], [1], [0, 0, 1, 1], [], []>} : vector<128x128xbf16>, vector<128x256xbf16>, vector<128x256xf32> -> vector<128x256xf32>
    %14 = arith.addf %13, %9 : vector<128x256xf32>
    %c0_14 = arith.constant 0 : index
    %c0_15 = arith.constant 0 : index
    %c0_16 = arith.constant 0 : index
    %15 = vector.load %arg6[%c0_14, %c0_15, %c0_16] : memref<1x1x256xf32, #tpu.memory_space<vmem>>, vector<1x1x256xf32>
    %16 = vector.shape_cast %15 : vector<1x1x256xf32> to vector<1x256xf32>
    %17 = vector.broadcast %16 : vector<1x256xf32> to vector<128x256xf32>
    %18 = arith.addf %14, %17 : vector<128x256xf32>
    %cst_17 = arith.constant 0.000000e+00 : f32
    %19 = vector.broadcast %cst_17 : f32 to vector<128x256xf32>
    %20 = arith.maximumf %18, %19 : vector<128x256xf32>
    %21 = arith.truncf %20 : vector<128x256xf32> to vector<128x256xbf16>
    %c0_18 = arith.constant 0 : index
    %c0_19 = arith.constant 0 : index
    %c0_20 = arith.constant 0 : index
    %22 = vector.load %arg7[%c0_18, %c0_19, %c0_20] : memref<1x256x128xbf16, #tpu.memory_space<vmem>>, vector<1x256x128xbf16>
    %23 = vector.shape_cast %22 : vector<1x256x128xbf16> to vector<256x128xbf16>
    %cst_21 = arith.constant dense<0.000000e+00> : vector<128x128xf32>
    %24 = tpu.matmul %21, %23, %cst_21 {dimension_numbers = #tpu.dot_dimension_numbers<[1], [0], [0], [1], [0, 0, 1, 1], [], []>} : vector<128x256xbf16>, vector<256x128xbf16>, vector<128x128xf32> -> vector<128x128xf32>
    %c0_22 = arith.constant 0 : index
    %c0_23 = arith.constant 0 : index
    %c0_24 = arith.constant 0 : index
    %25 = vector.load %arg8[%c0_22, %c0_23, %c0_24] : memref<1x1x128xf32, #tpu.memory_space<vmem>>, vector<1x1x128xf32>
    %26 = vector.shape_cast %25 : vector<1x1x128xf32> to vector<1x128xf32>
    %27 = vector.broadcast %26 : vector<1x128xf32> to vector<128x128xf32>
    %28 = arith.addf %24, %27 : vector<128x128xf32>
    %c2_i32 = arith.constant 2 : i32
    %29 = arith.cmpi eq, %arg0, %c2_i32 : i32
    %30 = arith.extui %29 : i1 to i32
    %c0_i32_25 = arith.constant 0 : i32
    %31 = arith.cmpi ne, %30, %c0_i32_25 : i32
    scf.if %31 {
      %c0_28 = arith.constant 0 : index
      %c0_29 = arith.constant 0 : index
      %35 = vector.load %arg9[%c0_28, %c0_29] : memref<128x128xf32, #tpu.memory_space<vmem>>, vector<128x128xf32>
      tpu.vector_store %arg9[%c0_28, %c0_29], %28 {strides = array<i32>} : memref<128x128xf32, #tpu.memory_space<vmem>>, vector<128x128xf32>,
    } else {
    }
    %c2_i32_26 = arith.constant 2 : i32
    %32 = arith.cmpi slt, %arg0, %c2_i32_26 : i32
    %33 = arith.extui %32 : i1 to i32
    %c0_i32_27 = arith.constant 0 : i32
    %34 = arith.cmpi ne, %33, %c0_i32_27 : i32
    scf.if %34 {
      %cst_28 = arith.constant 0.000000e+00 : f32
      %35 = vector.broadcast %cst_28 : f32 to vector<128x128xf32>
      %36 = arith.maximumf %28, %35 : vector<128x128xf32>
      %37 = arith.truncf %36 : vector<128x128xf32> to vector<128x128xbf16>
      %c0_29 = arith.constant 0 : index
      %c0_30 = arith.constant 0 : index
      %38 = vector.load %arg10[%c0_29, %c0_30] : memref<128x128xbf16, #tpu.memory_space<vmem>>, vector<128x128xbf16>
      tpu.vector_store %arg10[%c0_29, %c0_30], %37 {strides = array<i32>} : memref<128x128xbf16, #tpu.memory_space<vmem>>, vector<128x128xbf16>,
    } else {
    }
    return
  }
  func.func @transform_0(%arg0: i32) -> (i32, i32) {
    %c0_i32 = arith.constant 0 : i32
    %c0_i32_0 = arith.constant 0 : i32
    %c0_i32_1 = arith.constant 0 : i32
    return %c0_i32, %c0_i32_0 : i32, i32
  }
  func.func @transform_1(%arg0: i32) -> (i32, i32) {
    %c0_i32 = arith.constant 0 : i32
    %c0_i32_0 = arith.constant 0 : i32
    %c0_i32_1 = arith.constant 0 : i32
    return %c0_i32, %c0_i32_0 : i32, i32
  }
  func.func @transform_2(%arg0: i32) -> (i32, i32) {
    %c0_i32 = arith.constant 0 : i32
    %c0_i32_0 = arith.constant 0 : i32
    %c0_i32_1 = arith.constant 0 : i32
    return %c0_i32, %c0_i32_0 : i32, i32
  }
  func.func @transform_3(%arg0: i32) -> (i32, i32, i32) {
    %c0_i32 = arith.constant 0 : i32
    %c0_i32_0 = arith.constant 0 : i32
    %c0_i32_1 = arith.constant 0 : i32
    return %arg0, %c0_i32, %c0_i32_0 : i32, i32, i32
  }
  func.func @transform_4(%arg0: i32) -> (i32, i32, i32) {
    %c0_i32 = arith.constant 0 : i32
    %c0_i32_0 = arith.constant 0 : i32
    %c0_i32_1 = arith.constant 0 : i32
    return %arg0, %c0_i32, %c0_i32_0 : i32, i32, i32
  }
  func.func @transform_5(%arg0: i32) -> (i32, i32, i32) {
    %c0_i32 = arith.constant 0 : i32
    %c0_i32_0 = arith.constant 0 : i32
    %c0_i32_1 = arith.constant 0 : i32
    return %arg0, %c0_i32, %c0_i32_0 : i32, i32, i32
  }
  func.func @transform_6(%arg0: i32) -> (i32, i32, i32) {
    %c0_i32 = arith.constant 0 : i32
    %c0_i32_0 = arith.constant 0 : i32
    %c0_i32_1 = arith.constant 0 : i32
    return %arg0, %c0_i32, %c0_i32_0 : i32, i32, i32
  }
  func.func @transform_7(%arg0: i32) -> (i32, i32, i32) {
    %c0_i32 = arith.constant 0 : i32
    %c0_i32_0 = arith.constant 0 : i32
    %c0_i32_1 = arith.constant 0 : i32
    return %arg0, %c0_i32, %c0_i32_0 : i32, i32, i32
  }
  func.func @transform_8(%arg0: i32) -> (i32, i32) {
    %c0_i32 = arith.constant 0 : i32
    %c0_i32_0 = arith.constant 0 : i32
    %c0_i32_1 = arith.constant 0 : i32
    return %c0_i32, %c0_i32_0 : i32, i32
  }
}

</mosaic_0001>

<bundles_post_ra>
// kernel: tpu_custom_call.1
= control target key start
LH: loop header
LB: loop body
LE: loop exit
PB: predicated region body
PF: predicated region fallthrough
CT: control target
= control target key end

     0   :  { %s2997_s0 = inlined_call_operand.hbm [shape: bf16[128,128], index: 0, kind: input, shape index: {}]   ;;  %s2998_s1 = inlined_call_operand.hbm [shape: bf16[128,128], index: 1, kind: input, shape index: {}]   ;;  %s2999_s2 = inlined_call_operand.hbm [shape: bf16[128,128], index: 2, kind: input, shape index: {}]   ;;  %s3000_s3 = inlined_call_operand.hbm [shape: bf16[3,128,256], index: 3, kind: input, shape index: {}]   ;;  %s3001_s4 = inlined_call_operand.hbm [shape: bf16[3,128,256], index: 4, kind: input, shape index: {}]   ;;  %s3002_s5 = inlined_call_operand.vmem [shape: f32[3,1,256], index: 5, kind: input, shape index: {}]   ;;  %s3003_s6 = inlined_call_operand.hbm [shape: bf16[3,256,128], index: 6, kind: input, shape index: {}]   ;;  %s3004_s7 = inlined_call_operand.vmem [shape: f32[3,1,128], index: 7, kind: input, shape index: {}]   ;;  %s3005_s8 = inlined_call_operand.hbm [shape: f32[128,128], index: 8, kind: output, shape index: {}]  }
   0x1   :  { %3024 = sst [smem:[#allocation22_spill]] %s2998_s1 }
   0x2   :  { %3025 = sst [smem:[#allocation23_spill]] %s3000_s3 }
   0x3   :  { %3026 = sst [smem:[#allocation24_spill]] %s3002_s5 }
   0x4   :  { %3027 = sst [smem:[#allocation25_spill]] %s3005_s8 }
   0x5   :  { %13 = vsyncpa [#allocation4], 0 }
   0x6   :  { %14 = vsyncpa [#allocation7], 0 }
   0x7   :  { %15 = vsyncpa [#allocation10], 0 }
   0x8   :  { %17 = vsyncpa [#allocation10 + $0x1], 0 }
   0x9   :  { %18 = vsyncpa [#allocation13], 0 }
   0xa   :  { %20 = vsyncpa [#allocation13 + $0x1], 0 }
   0xb   :  { %21 = vsyncpa [#allocation5], 0  ;;  %s2477_s27 = smov 0   ;;  %s2479_s28 = smov 0  }
   0xc   :  { %s2481_s29 = smov 0   ;;  %s2483_s30 = smov 0  }
   0xd LB: > { %s2496_s9 = sadd.s32 4294967295, %s2416_s30   ;;  %s2499_s10 = sadd.s32 1, %s2416_s30   ;;  %s2416_s30 = sphi %s2483_s30, %s3057_s30   ;;  %s2412_s29 = sphi %s2481_s29, %s3061_s29   ;;  %s2408_s28 = sphi %s2479_s28, %s3060_s28   ;;  %s2404_s27 = sphi %s2477_s27, %s3059_s27  }
   0xe   : > { %3028 = sst [smem:[#allocation20_spill]] %s2499_s10  ;;  %s94_s11 = ssub.s32 %s2416_s30, %s2499_s10 }
   0xf   : > { %s97_s12 = sadd.s32 1, %s2412_s29  ;;  %p95_p0 = scmp.eq.s32.totalorder %s94_s11, 0 }
  0x10   : > { %p104_p1 = scmp.ne.s32.totalorder %s2412_s29, %s2408_s28  ;;  %p105_p2 = scmp.eq.s32.totalorder %s2416_s30, 0 }
  0x11   : > { %p110_p3 = scmp.ne.s32.totalorder %s2408_s28, %s2404_s27  ;;  %p3006_p5 = scmp.eq.s32.totalorder %s2496_s9, 0 }
  0x12   : > { %s2509_s13 = scalar_select %p95_p0, %s2412_s29, %s97_s12  }
  0x13   : > { %p2511_p4 = por %p105_p2, %p104_p1  ;;  %p1735_p6 = scmp.ge.s32.totalorder %s2416_s30, 1 }
  0x14   : > { %3029 = sst [smem:[#allocation21_spill]] %s2509_s13  ;;  %p246_p7 = scmp.lt.s32.totalorder %s2416_s30, 4 }
  0x15   : > { %s3030_s14 = scalar_select %p2511_p4, 1, 0 }
  0x16   : > { %p2520_p8 = por %p3006_p5, %p110_p3  ;;  %p2525_p10 = pnand %p1735_p6, %p246_p7 }
  0x17   : > { %s2418_s17 = smov [#allocation6]   ;;  %s298_s20 = sand.u32 1, %s2416_s30  }
  0x18   : > { %s3031_s15 = scalar_select %p2520_p8, 1, 0 }
  0x19   : > { %s3032_s16 = scalar_select %p2525_p10, 1, 0 }
  0x1a   : > { %p2006_p11 = pneg %p2525_p10  ;;  %s271_s18 = sshll.u32 %s2418_s17, 4  ;;  %s272_s18 = int_to_ptr.vmem [resolvable:$true] %s271_s18 }
  0x1b   : > { %s3012_s21 = sand.u32 1, %s2412_s29   ;;  %s3034_s1 = sld [smem:[#allocation22_spill]] }
  0x1c   : > { %p2533_p12 = pnand %p2006_p11, %p3006_p5 }
  0x1e   : > { %s3033_s19 = scalar_select %p2533_p12, 1, 0 }
  0x1f   : > { %p2548_p1 = pneg %p2533_p12 }
  0x21   : > { %s2166_s24 = scalar_lea.hbm %s3034_s1, 1024 }
  0x22   : > { %p2167_p0 = scmp.ne.s32.totalorder %s3034_s1, %s2166_s24  ;;  %p2173_p6 = scmp.lt.u32.totalorder %s2166_s24, %s3034_s1 }
  0x23   : > { %s3035_s27 = scalar_select %p2548_p1, 1, 0 }
  0x24   : > { %p2169_p2 = pnand %p2548_p1, %p2167_p0 }
  0x26   : > { %p2170_p3 = pneg %p2169_p2 }
  0x28   : > { %p2175_p7 = pnand %p2173_p6, %p2170_p3 }
  0x2a   : > { %2178 = shalt.err (!%p2175_p7)
}
  0x2b   : > { %s2179_s17 = scalar_lea.vmem %s272_s18, 1024  ;;  %p2187_p13 = scmp.lt.s32.totalorder %s272_s18, %s272_s18 }
  0x2c   : > { %p2180_p11 = scmp.ne.s32.totalorder %s272_s18, %s2179_s17  ;;  %p2188_p8 = scmp.lt.s32.totalorder %s2179_s17, %s2179_s17 }
  0x2e   : > { %p2182_p9 = pnand %p2180_p11, %p2548_p1  ;;  %p2189_p10 = por %p2188_p8, %p2187_p13 }
  0x30   : > { %p2183_p5 = pneg %p2182_p9 }
  0x32   : > { %p2190_p4 = pnand %p2189_p10, %p2183_p5 }
  0x34   : > { %2193 = shalt.err (!%p2190_p4)
}
  0x35   : > { %s3017_s22 = smov 64   ;;  %s3019_s23 = smov 4  }
  0x36   : > { %2012 = dma.hbm_to_vmem [thread:$0]  (!%p2533_p12), %s3034_s1, 1024, %s272_s18, [#allocation7], %s3017_s22, %s3017_s22, %s3019_s23  }
  0x37   : > { %s2569_s26 = sshll.u32 %s3012_s21, 7  ;;  %s2572_s11 = sshll.u32 %s2416_s30, 11 }
  0x38   : > { %s3036_s3 = sld [smem:[#allocation23_spill]]  ;;  %s302_s10 = scalar_lea.vmem [#allocation9], %s2569_s26 }
  0x39   : > { %s309_s8 = sshll.u32 %s302_s10, 4  ;;  %p3037_p4 = scmp.ne.s32.totalorder %s3030_s14, 0  ;;  %s2589_s8 = int_to_ptr.vmem [resolvable:$true] %s309_s8 }
  0x3a   : > { %p3038_p5 = scmp.lt.s32.totalorder %s2416_s30, 3  ;;  %s2591_s24 = scalar_lea.sflag [#allocation10], %s298_s20 }
  0x3c   : > { %p2585_p8 = pnand %p3038_p5, %p3037_p4 }
  0x3e   : > { %s2578_s13 = scalar_lea.hbm %s3036_s3, %s2572_s11  ;;  %p2597_p10 = pneg %p2585_p8 }
  0x3f   : > { %s3039_s18 = scalar_select %p2585_p8, 1, 0 }
  0x40   : > { %s2194_s25 = scalar_lea.hbm %s2578_s13, 2048  ;;  %s2199_s14 = scalar_lea.hbm %s3036_s3, 6144 }
  0x41   : > { %p2195_p9 = scmp.ne.s32.totalorder %s2578_s13, %s2194_s25  ;;  %p2200_p2 = scmp.lt.u32.totalorder %s2578_s13, %s3036_s3 }
  0x42   : > { %p2201_p3 = scmp.lt.u32.totalorder %s2199_s14, %s2194_s25  ;;  %p2203_p7 = scmp.lt.u32.totalorder %s2194_s25, %s2578_s13 }
  0x43   : > { %p2197_p13 = pnand %p2597_p10, %p2195_p9 }
  0x44   : > { %p2202_p6 = por %p2201_p3, %p2200_p2 }
  0x45   : > { %p2198_p0 = pneg %p2197_p13 }
  0x46   : > { %p2204_p11 = por %p2203_p7, %p2202_p6 }
  0x48   : > { %p2205_p4 = pnand %p2204_p11, %p2198_p0 }
  0x4a   : > { %2208 = shalt.err (!%p2205_p4)
}
  0x4b   : > { %s2209_s20 = scalar_lea.vmem %s2589_s8, 2048  ;;  %s2421_s30 = smov [#allocation9]  }
  0x4c   : > { %p2210_p5 = scmp.ne.s32.totalorder %s2589_s8, %s2209_s20  ;;  %s2214_s10 = sshll.u32 %s2421_s30, 4  ;;  %s2215_s10 = int_to_ptr.vmem [resolvable:$false] %s2214_s10 }
  0x4d   : > { %s2216_s21 = scalar_lea.vmem %s2215_s10, 4096  ;;  %p2217_p12 = scmp.lt.s32.totalorder %s2589_s8, %s2215_s10 }
  0x4e   : > { %p2212_p9 = pnand %p2210_p5, %p2597_p10  ;;  %p2218_p1 = scmp.lt.s32.totalorder %s2216_s21, %s2209_s20 }
  0x50   : > { %p2213_p13 = pneg %p2212_p9  ;;  %p2219_p2 = por %p2218_p1, %p2217_p12 }
  0x52   : > { %p2220_p3 = pnand %p2219_p2, %p2213_p13 }
  0x54   : > { %2223 = shalt.err (!%p2220_p3)
}
  0x55   : > { %s3023_s25 = smov 128   ;;  %s2423_s14 = smov 8  }
  0x56   : > { %2019 = dma.hbm_to_vmem [thread:$0]  (!%p2585_p8), %s2578_s13, 2048, %s2589_s8, %s2591_s24, %s3023_s25, %s3023_s25, %s2423_s14  }
  0x57   : > { %s2424_s17 = smov [#allocation3]   ;;  %s2425_s22 = smov [#allocation8]  }
  0x58   : > { %s258_s30 = sshll.u32 %s2424_s17, 4  ;;  %s284_s10 = sshll.u32 %s2425_s22, 4  ;;  %s259_s30 = int_to_ptr.vmem [resolvable:$true] %s258_s30  ;;  %s2624_s10 = int_to_ptr.vmem [resolvable:$true] %s284_s10 }
  0x59   : > { %s2224_s23 = scalar_lea.hbm %s2997_s0, 1024  ;;  %p3041_p1 = scmp.ne.s32.totalorder %s3035_s27, 0 }
  0x5a   : > { %p2225_p12 = scmp.ne.s32.totalorder %s2997_s0, %s2224_s23  ;;  %p2231_p7 = scmp.lt.u32.totalorder %s2224_s23, %s2997_s0 }
  0x5c   : > { %p2227_p0 = pnand %p2225_p12, %p3041_p1 }
  0x5e   : > { %p2228_p6 = pneg %p2227_p0 }
  0x60   : > { %p2233_p11 = pnand %p2231_p7, %p2228_p6 }
  0x62   : > { %2236 = shalt.err (!%p2233_p11)
}
  0x63   : > { %s2237_s13 = scalar_lea.vmem %s259_s30, 1024  ;;  %p2245_p13 = scmp.lt.s32.totalorder %s259_s30, %s259_s30 }
  0x64   : > { %p2238_p4 = scmp.ne.s32.totalorder %s259_s30, %s2237_s13  ;;  %p2246_p2 = scmp.lt.s32.totalorder %s2237_s13, %s2237_s13 }
  0x66   : > { %p2240_p5 = pnand %p2238_p4, %p3041_p1  ;;  %p2247_p3 = por %p2246_p2, %p2245_p13 }
  0x68   : > { %p2241_p9 = pneg %p2240_p5 }
  0x6a   : > { %p2248_p8 = pnand %p2247_p3, %p2241_p9 }
  0x6c   : > { %2251 = shalt.err (!%p2248_p8)
}
  0x6d   : > { %p3042_p12 = scmp.ne.s32.totalorder %s3033_s19, 0  ;;  %s3043_s1 = smov 4  }
  0x6e   : > { %s3044_s3 = smov 64   ;;  %s2252_s20 = scalar_lea.hbm %s2999_s2, 1024 }
  0x6f   : > { %2009 = dma.hbm_to_vmem [thread:$0]  (!%p3042_p12), %s2997_s0, 1024, %s259_s30, [#allocation4], %s3044_s3, %s3044_s3, %s3043_s1  }
  0x70   : > { %p2253_p0 = scmp.ne.s32.totalorder %s2999_s2, %s2252_s20  ;;  %p2259_p7 = scmp.lt.u32.totalorder %s2252_s20, %s2999_s2 }
  0x72   : > { %p2255_p8 = pnand %p2253_p0, %p3041_p1 }
  0x74   : > { %p2256_p6 = pneg %p2255_p8 }
  0x76   : > { %p2261_p11 = pnand %p2259_p7, %p2256_p6 }
  0x78   : > { %2264 = shalt.err (!%p2261_p11)
}
  0x79   : > { %s2265_s30 = scalar_lea.vmem %s2624_s10, 1024  ;;  %p2273_p13 = scmp.lt.s32.totalorder %s2624_s10, %s2624_s10 }
  0x7a   : > { %p2266_p4 = scmp.ne.s32.totalorder %s2624_s10, %s2265_s30  ;;  %p2274_p2 = scmp.lt.s32.totalorder %s2265_s30, %s2265_s30 }
  0x7c   : > { %p2268_p5 = pnand %p2266_p4, %p3041_p1  ;;  %p2275_p3 = por %p2274_p2, %p2273_p13 }
  0x7e   : > { %p2269_p9 = pneg %p2268_p5 }
  0x80   : > { %p2276_p0 = pnand %p2275_p3, %p2269_p9 }
  0x82   : > { %2279 = shalt.err (!%p2276_p0)
}
  0x83   : > { %2015 = dma.hbm_to_vmem [thread:$0]  (!%p3042_p12), %s2999_s2, 1024, %s2624_s10, [#allocation7], %s3044_s3, %s3044_s3, %s3043_s1  }
  0x84   : > { %s2677_s23 = scalar_lea.hbm %s3001_s4, %s2572_s11  ;;  %s323_s19 = scalar_lea.vmem [#allocation11], %s2569_s26 }
  0x85   : > { %s330_s17 = sshll.u32 %s323_s19, 4  ;;  %s2280_s20 = scalar_lea.hbm %s2677_s23, 2048  ;;  %s2680_s17 = int_to_ptr.vmem [resolvable:$true] %s330_s17 }
  0x86   : > { %p2281_p1 = scmp.ne.s32.totalorder %s2677_s23, %s2280_s20  ;;  %s2285_s8 = scalar_lea.hbm %s3001_s4, 6144 }
  0x87   : > { %p2286_p12 = scmp.lt.u32.totalorder %s2677_s23, %s3001_s4  ;;  %p2287_p7 = scmp.lt.u32.totalorder %s2285_s8, %s2280_s20 }
  0x88   : > { %p2283_p8 = pnand %p2281_p1, %p2597_p10  ;;  %p2289_p4 = scmp.lt.u32.totalorder %s2280_s20, %s2677_s23 }
  0x89   : > { %p2288_p11 = por %p2287_p7, %p2286_p12 }
  0x8a   : > { %p2284_p6 = pneg %p2283_p8 }
  0x8b   : > { %p2290_p5 = por %p2289_p4, %p2288_p11 }
  0x8d   : > { %p2291_p9 = pnand %p2290_p5, %p2284_p6 }
  0x8f   : > { %2294 = shalt.err (!%p2291_p9)
}
  0x90   : > { %s2295_s25 = scalar_lea.vmem %s2680_s17, 2048  ;;  %s2426_s5 = smov [#allocation11]  }
  0x91   : > { %p2296_p13 = scmp.ne.s32.totalorder %s2680_s17, %s2295_s25  ;;  %s2300_s27 = sshll.u32 %s2426_s5, 4  ;;  %s2301_s27 = int_to_ptr.vmem [resolvable:$false] %s2300_s27 }
  0x92   : > { %s2302_s22 = scalar_lea.vmem %s2301_s27, 4096  ;;  %p2303_p0 = scmp.lt.s32.totalorder %s2680_s17, %s2301_s27 }
  0x93   : > { %p2298_p2 = pnand %p2296_p13, %p2597_p10  ;;  %p2304_p1 = scmp.lt.s32.totalorder %s2302_s22, %s2295_s25 }
  0x95   : > { %p2299_p3 = pneg %p2298_p2  ;;  %p2305_p8 = por %p2304_p1, %p2303_p0 }
  0x97   : > { %p2306_p12 = pnand %p2305_p8, %p2299_p3 }
  0x99   : > { %2309 = shalt.err (!%p2306_p12)
}
  0x9a   : > { %p3045_p6 = scmp.ne.s32.totalorder %s3039_s18, 0  ;;  %s3046_s19 = smov 128  }
  0x9b   : > { %s2711_s10 = scalar_lea.hbm %s3003_s6, %s2572_s11  ;;  %s351_s8 = scalar_lea.vmem [#allocation12], %s2569_s26 }
  0x9c   : > { %2022 = dma.hbm_to_vmem [thread:$0]  (!%p3045_p6), %s2677_s23, 2048, %s2680_s17, %s2591_s24, %s3046_s19, %s3046_s19, %s2423_s14  }
  0x9d   : > { %s358_s13 = sshll.u32 %s351_s8, 4  ;;  %s3047_s30 = sand.u32 1, %s2412_s29   ;;  %s2714_s13 = int_to_ptr.vmem [resolvable:$true] %s358_s13 }
  0x9e   : > { %s2718_s25 = scalar_lea.sflag [#allocation13], %s3047_s30  ;;  %s2310_s5 = scalar_lea.hbm %s2711_s10, 2048 }
  0x9f   : > { %p2311_p7 = scmp.ne.s32.totalorder %s2711_s10, %s2310_s5  ;;  %s2315_s11 = scalar_lea.hbm %s3003_s6, 6144 }
  0xa0   : > { %p2316_p5 = scmp.lt.u32.totalorder %s2711_s10, %s3003_s6  ;;  %p2317_p9 = scmp.lt.u32.totalorder %s2315_s11, %s2310_s5 }
  0xa1   : > { %p2313_p11 = pnand %p2311_p7, %p2597_p10  ;;  %p2319_p2 = scmp.lt.u32.totalorder %s2310_s5, %s2711_s10 }
  0xa2   : > { %p2318_p13 = por %p2317_p9, %p2316_p5 }
  0xa3   : > { %p2314_p4 = pneg %p2313_p11 }
  0xa4   : > { %p2320_p3 = por %p2319_p2, %p2318_p13 }
  0xa6   : > { %p2321_p0 = pnand %p2320_p3, %p2314_p4 }
  0xa8   : > { %2324 = shalt.err (!%p2321_p0)
}
  0xa9   : > { %s2325_s26 = scalar_lea.vmem %s2714_s13, 2048  ;;  %s2427_s27 = smov [#allocation12]  }
  0xaa   : > { %p2326_p1 = scmp.ne.s32.totalorder %s2714_s13, %s2325_s26  ;;  %s2330_s22 = sshll.u32 %s2427_s27, 4  ;;  %s2331_s22 = int_to_ptr.vmem [resolvable:$false] %s2330_s22 }
  0xab   : > { %s2332_s19 = scalar_lea.vmem %s2331_s22, 4096  ;;  %p2333_p7 = scmp.lt.s32.totalorder %s2714_s13, %s2331_s22 }
  0xac   : > { %p2328_p8 = pnand %p2326_p1, %p2597_p10  ;;  %p2334_p11 = scmp.lt.s32.totalorder %s2332_s19, %s2325_s26 }
  0xae   : > { %p2329_p12 = pneg %p2328_p8  ;;  %p2335_p5 = por %p2334_p11, %p2333_p7 }
  0xb0   : > { %p2336_p9 = pnand %p2335_p5, %p2329_p12 }
  0xb2   : > { %2339 = shalt.err (!%p2336_p9)
}
  0xb3   : > { %2025 = dma.hbm_to_vmem [thread:$0]  (!%p3045_p6), %s2711_s10, 2048, %s2714_s13, %s2718_s25, %s3044_s3, %s3044_s3, %s3043_s1  }
  0xb4   : > { %p3048_p10 = scmp.ne.s32.totalorder %s3032_s16, 0 }
  0xb5   : > { %p3049_p4 = scmp.eq.s32.totalorder (!%p3048_p10), %s2496_s9, 0 }
  0xb6   : > { %376 = sbr.rel (%p3048_p10) target bundleno = 1003 (0x3eb), region = 52 }
  0xbd   : > { %2383 = dma.done.wait (%p3049_p4), [#allocation4], 1024   ;;  %p3050_p13 = pmov %p3049_p4 }
  0xbe   : > { %p3051_p2 = pmov %p3049_p4 }
  0xbf   : > { %2385 = vsyncadd (%p3050_p13), [#allocation4], 4294966272 }
  0xc0   : > { %2387 = dma.done.wait (%p3051_p2), [#allocation7], 2048   ;;  %p3052_p3 = pmov %p3051_p2 }
  0xc1   : > { %s390_s18 = sand.u32 1, %s2496_s9   ;;  %s392_s12 = sand.u32 1, %s2408_s28  }
  0xc2   : > { %2389 = vsyncadd (%p3052_p3), [#allocation7], 4294965248  ;;  %s1753_s1 = sshll.u32 %s392_s12, 7  ;;  %s391_s16 = scalar_lea.sflag [#allocation10], %s390_s18 }
  0xc3   : > { %s2757_s3 = scalar_lea.vmem [#allocation9], %s1753_s1  ;;  %p3053_p6 = scmp.ne.s32.totalorder %s3031_s15, 0 }
  0xc5   : > { %2391 = dma.done.wait (%p3053_p6), %s391_s16, 4096  }
  0xc6   : > { %2393 = vsyncadd (%p3053_p6), %s391_s16, 4294963200  ;;  %s2763_s20 = scalar_lea.vmem [#allocation11], %s1753_s1  ;;  %s409_s21 = scalar_lea.sflag [#allocation13], %s392_s12 }
  0xc7   : > { %s2765_s10 = scalar_lea.vmem [#allocation12], %s1753_s1 }
  0xc8   : > { %2395 = dma.done.wait (%p3053_p6), %s409_s21, 2048  }
  0xc9   : > { %2397 = vsyncadd (%p3053_p6), %s409_s21, 4294965248  ;;  %p457_p0 = scmp.lt.s32.totalorder %s2496_s9, 2  ;;  %s3054_s11 = sld [smem:[#allocation24_spill]] }
  0xca   : > { %p3055_p1 = scmp.ne.s32.totalorder %s2496_s9, 0 }
  0xcb   : > { %s2773_s8 = scalar_select %p457_p0, %s2496_s9, 2 }
  0xcc   : > { %468 = sbr.rel (%p3055_p1) target bundleno = 211 (0xd3), region = 80  ;;  %v2078_v0 = vld [vmem:[#allocation6] sm:$0xff] (!%p3055_p1)   ;;  %v2079_v1 = vld [vmem:[#allocation6 + $0x8] sm:$0xff] (!%p3055_p1)   ;;  %v2080_v2 = vld [vmem:[#allocation6 + $0x10] sm:$0xff] (!%p3055_p1)  }
  0xcd   : > { %s1756_s13 = sshll.u32 %s2773_s8, 1  ;;  %s463_s5 = scalar_lea.vmem %s3004_s7, %s2773_s8  ;;  %533 = vst [vmem:[#allocation2] sm:$0xff] (!%p3055_p1), %v2078_v0  ;;  %534 = vst [vmem:[#allocation2 + $0x8] sm:$0xff] (!%p3055_p1), %v2079_v1  ;;  %v2081_v3 = vld [vmem:[#allocation6 + $0x18] sm:$0xff] (!%p3055_p1)   ;;  %v2082_v4 = vld [vmem:[#allocation6 + $0x20] sm:$0xff] (!%p3055_p1)  }
  0xce   : > { %535 = vst [vmem:[#allocation2 + $0x10] sm:$0xff] (!%p3055_p1), %v2080_v2  ;;  %536 = vst [vmem:[#allocation2 + $0x18] sm:$0xff] (!%p3055_p1), %v2081_v3  ;;  %v2083_v5 = vld [vmem:[#allocation6 + $0x28] sm:$0xff] (!%p3055_p1)   ;;  %v2084_v6 = vld [vmem:[#allocation6 + $0x30] sm:$0xff] (!%p3055_p1)  }
  0xcf   : > { %s2783_s23 = scalar_lea.vmem %s3054_s11, %s1756_s13  ;;  %537 = vst [vmem:[#allocation2 + $0x20] sm:$0xff] (!%p3055_p1), %v2082_v4  ;;  %538 = vst [vmem:[#allocation2 + $0x28] sm:$0xff] (!%p3055_p1), %v2083_v5  ;;  %v2085_v7 = vld [vmem:[#allocation6 + $0x38] sm:$0xff] (!%p3055_p1)  }
  0xd0   : > { %539 = vst [vmem:[#allocation2 + $0x30] sm:$0xff] (!%p3055_p1), %v2084_v6  ;;  %540 = vst [vmem:[#allocation2 + $0x38] sm:$0xff] (!%p3055_p1), %v2085_v7 }
  0xd3 PF: > { %v2428_v10 = vmov 0   ;;  %v2086_v11 = vld [vmem:[#allocation3] sm:$0xff]   ;;  %v2097_v17 = vld [vmem:[%s2757_s3 + $0x14] ss:$8 sps:$4 sm:$0xff]   ;;  %v2099_v18 = vld [vmem:[%s2757_s3 + $0x10] ss:$8 sps:$4 sm:$0xff]  }
  0xd4   : > { %v557_v8 = vld [vmem:[#allocation2] sm:$0xff]  ;;  %v558_v9 = vld [vmem:[#allocation2 + $0x8] sm:$0xff]  ;;  %902 = vmatprep.mubr.bf16.mxu1 %v2428_v10  ;;  %1936 = vmatprep.mubr.bf16.mxu0 %v2086_v11  ;;  %v2103_v22 = vld [vmem:[%s2757_s3 + $0x34] ss:$8 sps:$4 sm:$0xff]   ;;  %p1831_p8 = scmp.ne.s32.totalorder %s2496_s9, 2 }
  0xd5   : > { %1920 = vmatprep.subr.bf16.mxu0 %v557_v8  ;;  %v559_v12 = vld [vmem:[#allocation2 + $0x10] sm:$0xff]  ;;  %v560_v13 = vld [vmem:[#allocation2 + $0x18] sm:$0xff]  ;;  %v2094_v15 = vld [vmem:[%s2757_s3 + $0x4] ss:$8 sps:$4 sm:$0xff]  }
  0xd6   : > { %1921 = vmatpush3.bf16.msra.mxu0 %v557_v8  ;;  %v561_v14 = vld [vmem:[#allocation2 + $0x20] sm:$0xff]  ;;  %870 = vmatprep.subr.bf16.mxu1 %v2094_v15  ;;  %v562_v20 = vld [vmem:[#allocation2 + $0x28] sm:$0xff]  ;;  %v2105_v24 = vld [vmem:[%s2757_s3 + $0x30] ss:$8 sps:$4 sm:$0xff]  }
  0xd7   : > { %1922 = vmatprep.subr.bf16.mxu0 %v558_v9  ;;  %v2096_v16 = vld [vmem:[%s2757_s3] ss:$8 sps:$4 sm:$0xff]   ;;  %v2100_v19 = vld [vmem:[%s2757_s3 + $0x24] ss:$8 sps:$4 sm:$0xff]   ;;  %v563_v23 = vld [vmem:[#allocation2 + $0x30] sm:$0xff] }
  0xd8   : > { %871 = vmatpush1.bf16.msra.mxu1 %v2096_v16  ;;  %v2102_v21 = vld [vmem:[%s2757_s3 + $0x20] ss:$8 sps:$4 sm:$0xff]   ;;  %v2106_v25 = vld [vmem:[%s2757_s3 + $0x44] ss:$8 sps:$4 sm:$0xff]   ;;  %v564_v26 = vld [vmem:[#allocation2 + $0x38] sm:$0xff] }
  0xd9   : > { %872 = vmatprep.subr.bf16.mxu1 %v2097_v17  ;;  %v2108_v27 = vld [vmem:[%s2757_s3 + $0x40] ss:$8 sps:$4 sm:$0xff]   ;;  %v2109_v28 = vld [vmem:[%s2757_s3 + $0x54] ss:$8 sps:$4 sm:$0xff]   ;;  %v2111_v31 = vld [vmem:[%s2757_s3 + $0x50] ss:$8 sps:$4 sm:$0xff]  }
  0xda   : > { %1923 = vmatpush3.bf16.msra.mxu0 %v558_v9  ;;  %v2087_v29 = vld [vmem:[#allocation3 + $0x8] sm:$0xff]   ;;  %v2088_v30 = vld [vmem:[#allocation3 + $0x10] sm:$0xff]   ;;  %v2089_v35 = vld [vmem:[#allocation3 + $0x18] sm:$0xff]  }
  0xdb   : > { %1924 = vmatprep.subr.bf16.mxu0 %v559_v12  ;;  %v2112_v32 = vld [vmem:[%s2757_s3 + $0x64] ss:$8 sps:$4 sm:$0xff]   ;;  %v2114_v33 = vld [vmem:[%s2757_s3 + $0x60] ss:$8 sps:$4 sm:$0xff]   ;;  %v2115_v34 = vld [vmem:[%s2757_s3 + $0x74] ss:$8 sps:$4 sm:$0xff]  }
  0xdc   : > { %873 = vmatpush1.bf16.msra.mxu1 %v2099_v18  ;;  %v2090_v36 = vld [vmem:[#allocation3 + $0x20] sm:$0xff]   ;;  %v2117_v37 = vld [vmem:[%s2757_s3 + $0x70] ss:$8 sps:$4 sm:$0xff]   ;;  %v2124_v41 = vld [vmem:[%s2763_s20 + $0x14] ss:$8 sps:$4 sm:$0xff]  }
  0xdd   : > { %874 = vmatprep.subr.bf16.mxu1 %v2100_v19  ;;  %v2120_v38 = vld [vmem:[%s2763_s20 + $0x4] ss:$8 sps:$4 sm:$0xff]   ;;  %v2118_v40 = vld [vmem:[%s2763_s20] ss:$8 sps:$4 sm:$0xff]   ;;  %v2092_v43 = vld [vmem:[#allocation3 + $0x30] sm:$0xff]  }
  0xde   : > { %1925 = vmatpush3.bf16.msra.mxu0 %v559_v12  ;;  %v2121_v39 = vld [vmem:[#allocation8] sm:$0xff]   ;;  %v2091_v42 = vld [vmem:[#allocation3 + $0x28] sm:$0xff]   ;;  %v2122_v44 = vld [vmem:[%s2763_s20 + $0x10] ss:$8 sps:$4 sm:$0xff]  }
  0xdf   : > { %1926 = vmatprep.subr.bf16.mxu0 %v560_v13  ;;  %v2128_v45 = vld [vmem:[%s2763_s20 + $0x24] ss:$8 sps:$4 sm:$0xff]   ;;  %v2126_v47 = vld [vmem:[%s2763_s20 + $0x20] ss:$8 sps:$4 sm:$0xff]   ;;  %v2132_v48 = vld [vmem:[%s2763_s20 + $0x34] ss:$8 sps:$4 sm:$0xff]  }
  0xe0   : > { %875 = vmatpush1.bf16.msra.mxu1 %v2102_v21  ;;  %v2125_v46 = vld [vmem:[#allocation8 + $0x8] sm:$0xff]   ;;  %v2093_v49 = vld [vmem:[#allocation3 + $0x38] sm:$0xff]   ;;  %v2129_v52 = vld [vmem:[#allocation8 + $0x10] sm:$0xff]  }
  0xe1   : > { %876 = vmatprep.subr.bf16.mxu1 %v2103_v22  ;;  %v2130_v50 = vld [vmem:[%s2763_s20 + $0x30] ss:$8 sps:$4 sm:$0xff]   ;;  %v2136_v51 = vld [vmem:[%s2763_s20 + $0x44] ss:$8 sps:$4 sm:$0xff]   ;;  %v2134_v53 = vld [vmem:[%s2763_s20 + $0x40] ss:$8 sps:$4 sm:$0xff]  }
  0xe2   : > { %1927 = vmatpush3.bf16.msra.mxu0 %v560_v13  ;;  %v2140_v54 = vld [vmem:[%s2763_s20 + $0x54] ss:$8 sps:$4 sm:$0xff]   ;;  %v2138_v55 = vld [vmem:[%s2763_s20 + $0x50] ss:$8 sps:$4 sm:$0xff]   ;;  %v2144_v56 = vld [vmem:[%s2763_s20 + $0x64] ss:$8 sps:$4 sm:$0xff]  }
  0xe3   : > { %1928 = vmatprep.subr.bf16.mxu0 %v561_v14  ;;  %v2133_v57 = vld [vmem:[#allocation8 + $0x18] sm:$0xff]   ;;  %v2142_v58 = vld [vmem:[%s2763_s20 + $0x60] ss:$8 sps:$4 sm:$0xff]   ;;  %v2145_v63 = vld [vmem:[#allocation8 + $0x30] sm:$0xff]  }
  0xe4   : > { %877 = vmatpush1.bf16.msra.mxu1 %v2105_v24  ;;  %v2148_v59 = vld [vmem:[%s2763_s20 + $0x74] ss:$8 sps:$4 sm:$0xff]   ;;  %v2146_v60 = vld [vmem:[%s2763_s20 + $0x70] ss:$8 sps:$4 sm:$0xff]   ;;  %v2137_v61 = vld [vmem:[#allocation8 + $0x20] sm:$0xff]  }
  0xe5   : > { %878 = vmatprep.subr.bf16.mxu1 %v2106_v25  ;;  %v2141_v62 = vld [vmem:[#allocation8 + $0x28] sm:$0xff]   ;;  %v2149_v0 = vld [vmem:[#allocation8 + $0x38] sm:$0xff]   ;;  %v2150_v1 = vld [vmem:[%s2765_s10 + $0x40] sm:$0xff]  }
  0xe6   : > { %1929 = vmatpush3.bf16.msra.mxu0 %v561_v14  ;;  %v2151_v2 = vld [vmem:[%s2765_s10] sm:$0xff]   ;;  %v2152_v3 = vld [vmem:[%s2765_s10 + $0x48] sm:$0xff]   ;;  %v2154_v5 = vld [vmem:[%s2765_s10 + $0x50] sm:$0xff]  }
  0xe7   : > { %1930 = vmatprep.subr.bf16.mxu0 %v562_v20  ;;  %v2153_v4 = vld [vmem:[%s2765_s10 + $0x8] sm:$0xff]   ;;  %v2155_v6 = vld [vmem:[%s2765_s10 + $0x10] sm:$0xff]   ;;  %v2156_v7 = vld [vmem:[%s2765_s10 + $0x58] sm:$0xff]  }
  0xe8   : > { %879 = vmatpush1.bf16.msra.mxu1 %v2108_v27  ;;  %v2157_v8 = vld [vmem:[%s2765_s10 + $0x18] sm:$0xff]   ;;  %v2158_v9 = vld [vmem:[%s2765_s10 + $0x60] sm:$0xff]   ;;  %v2160_v12 = vld [vmem:[%s2765_s10 + $0x68] sm:$0xff]  }
  0xe9   : > { %880 = vmatprep.subr.bf16.mxu1 %v2109_v28  ;;  %v2159_v11 = vld [vmem:[%s2765_s10 + $0x20] sm:$0xff]   ;;  %v2161_v13 = vld [vmem:[%s2765_s10 + $0x28] sm:$0xff]  }
  0xea   : > { %1931 = vmatpush3.bf16.msra.mxu0 %v562_v20 }
  0xeb   : > { %1932 = vmatprep.subr.bf16.mxu0 %v563_v23 }
  0xec   : > { %881 = vmatpush1.bf16.msra.mxu1 %v2111_v31 }
  0xed   : > { %882 = vmatprep.subr.bf16.mxu1 %v2112_v32 }
  0xee   : > { %1933 = vmatpush3.bf16.msra.mxu0 %v563_v23 }
  0xef   : > { %1934 = vmatprep.subr.bf16.mxu0 %v564_v26 }
  0xf0   : > { %883 = vmatpush1.bf16.msra.mxu1 %v2114_v33 }
  0xf1   : > { %884 = vmatprep.subr.bf16.mxu1 %v2115_v34 }
  0xf2   : > { %1935 = vmatpush3.bf16.msra.mxu0 %v564_v26 }
  0xf3   : > { %1856 = vmatprep.subr.bf16.mxu0 %v2150_v1 }
  0xf4   : > { %885 = vmatpush1.bf16.msra.mxu1 %v2117_v37 }
  0xf5   : > { %1937 = vmatmul.mubr.bf16.vlgmr.msra.gmra.mrb[0].mxu0 %v2087_v29  ;;  %1087 = vmatprep.subr.bf16.mxu1 %v2120_v38  ;;  %v2162_v38 = vld [vmem:[%s2765_s10 + $0x70] sm:$0xff]  }
  0xf6   : > { %1940 = vmatprep.mubr.bf16.mxu0 %v2088_v30  ;;  %1857 = vmatpush3.bf16.msra.mxu0 %v2151_v2 }
  0xf7   : > { %903 = vmatmul.mubr.bf16.vlgmr.msra.gmra.mrb[0].mxu1 %v2121_v39  ;;  %1858 = vmatprep.subr.bf16.mxu0 %v2152_v3  ;;  %v2163_v39 = vld [vmem:[%s2765_s10 + $0x30] sm:$0xff]  }
  0xf8   : > { %1088 = vmatpush1.bf16.msra.mxu1 %v2118_v40  ;;  %912 = vmatprep.mubr.bf16.mxu1 %v2428_v10  ;;  %v2164_v40 = vld [vmem:[%s2765_s10 + $0x78] sm:$0xff]  }
  0xf9   : > { %1089 = vmatprep.subr.bf16.mxu1 %v2124_v41  ;;  %v2165_v41 = vld [vmem:[%s2765_s10 + $0x38] sm:$0xff]  }
  0xfa   : > { %1859 = vmatpush3.bf16.msra.mxu0 %v2153_v4 }
  0xfb   : > { %1860 = vmatprep.subr.bf16.mxu0 %v2154_v5 }
  0xfc   : > { %1090 = vmatpush1.bf16.msra.mxu1 %v2122_v44 }
  0xfd   : > { %1941 = vmatmul.mubr.bf16.gmra.mrb[4].mxu0 %v2089_v35  ;;  %1091 = vmatprep.subr.bf16.mxu1 %v2128_v45  ;;  %v1200_v45 = vld [vmem:[%s2783_s23] sm:$0x3] }
  0xfe   : > { %1944 = vmatprep.mubr.bf16.mxu0 %v2090_v36  ;;  %1861 = vmatpush3.bf16.msra.mxu0 %v2155_v6 }
  0xff   : > { %913 = vmatmul.mubr.bf16.gmra.mrb[4].mxu1 %v2125_v46  ;;  %1862 = vmatprep.subr.bf16.mxu0 %v2156_v7 }
 0x100   : > { %922 = vmatprep.mubr.bf16.mxu1 %v2428_v10  ;;  %1092 = vmatpush1.bf16.msra.mxu1 %v2126_v47 }
 0x101   : > { %1093 = vmatprep.subr.bf16.mxu1 %v2132_v48 }
 0x102   : > { %1863 = vmatpush3.bf16.msra.mxu0 %v2157_v8 }
 0x103   : > { %1864 = vmatprep.subr.bf16.mxu0 %v2158_v9 }
 0x104   : > { %1094 = vmatpush1.bf16.msra.mxu1 %v2130_v50 }
 0x105   : > { %1945 = vmatmul.mubr.bf16.gmra.mrb[8].mxu0 %v2091_v42  ;;  %1095 = vmatprep.subr.bf16.mxu1 %v2136_v51  ;;  %v1202_v42 = vlaneseq }
 0x106   : > { %1948 = vmatprep.mubr.bf16.mxu0 %v2092_v43  ;;  %1865 = vmatpush3.bf16.msra.mxu0 %v2159_v11 }
 0x107   : > { %923 = vmatmul.mubr.bf16.gmra.mrb[8].mxu1 %v2129_v52  ;;  %1866 = vmatprep.subr.bf16.mxu0 %v2160_v12  ;;  %v1203_v43 = vshrl.u32 %v1202_v42, 7 }
 0x108   : > { %932 = vmatprep.mubr.bf16.mxu1 %v2428_v10  ;;  %1096 = vmatpush1.bf16.msra.mxu1 %v2134_v53 }
 0x109   : > { %1097 = vmatprep.subr.bf16.mxu1 %v2140_v54  ;;  %v1204_v44 = vsub.s32 0, %v1203_v43  ;;  %v1208_v46 = vsub.s32 1, %v1203_v43 }
 0x10a   : > { %1867 = vmatpush3.bf16.msra.mxu0 %v2161_v13 }
 0x10b   : > { %1868 = vmatprep.subr.bf16.mxu0 %v2162_v38  ;;  %v2852_v47 = vrot.slane %v1200_v45, %v1204_v44  ;;  %v2854_v48 = vrot.slane %v1200_v45, %v1208_v46 }
 0x10c   : > { %1098 = vmatpush1.bf16.msra.mxu1 %v2138_v55 }
 0x10d   : > { %1949 = vmatmul.mubr.bf16.gmra.mrb[12].mxu0 %v2093_v49  ;;  %1099 = vmatprep.subr.bf16.mxu1 %v2144_v56 }
 0x10e   : > { %1869 = vmatpush3.bf16.msra.mxu0 %v2163_v39 }
 0x10f   : > { %933 = vmatmul.mubr.bf16.gmra.mrb[12].mxu1 %v2133_v57  ;;  %1870 = vmatprep.subr.bf16.mxu0 %v2164_v40 }
 0x110   : > { %942 = vmatprep.mubr.bf16.mxu1 %v2428_v10  ;;  %1100 = vmatpush1.bf16.msra.mxu1 %v2142_v58 }
 0x111   : > { %1101 = vmatprep.subr.bf16.mxu1 %v2148_v59 }
 0x112   : > { %1871 = vmatpush3.bf16.msra.mxu0 %v2165_v41 }
 0x114   : > { %1102 = vmatpush1.bf16.msra.mxu1 %v2146_v60 }
 0x117   : > { %943 = vmatmul.mubr.bf16.gmra.mrb[16].mxu1 %v2137_v61 }
 0x118   : > { %952 = vmatprep.mubr.bf16.mxu1 %v2428_v10 }
 0x11f   : > { %953 = vmatmul.mubr.bf16.gmra.mrb[20].mxu1 %v2141_v62 }
 0x120   : > { %962 = vmatprep.mubr.bf16.mxu1 %v2428_v10 }
 0x127   : > { %963 = vmatmul.mubr.bf16.gmra.mrb[24].mxu1 %v2145_v63 }
 0x128   : > { %972 = vmatprep.mubr.bf16.mxu1 %v2428_v10 }
 0x12f   : > { %973 = vmatmul.mubr.bf16.gmra.mrb[28].mxu1 %v2149_v0 }
 0x130   : > { %1119 = vmatprep.mubr.bf16.mxu1 %v2428_v10 }
 0x1c8   : > { %v1938_v14 = vpop.f32.mrb[0].mxu0 }
 0x1c9   : > { %v647_v15 = vpop.f32.mrb[1].mxu0 }
 0x1ca   : > { %v1939_v16 = vpop.f32.mrb[2].mxu0 }
 0x1cb   : > { %v984_v17 = vpack.c.bf16 %v1939_v16, %v1938_v14  ;;  %v650_v18 = vpop.f32.mrb[3].mxu0 }
 0x1cc   : > { %v983_v19 = vpack.c.bf16 %v650_v18, %v647_v15 }
 0x1ce   : > { %1120 = vmatmul.mubr.bf16.vlgmr.msra.gmra.mrb[0].mxu1 %v983_v19 }
 0x1cf   : > { %1129 = vmatprep.mubr.bf16.mxu1 %v2428_v10 }
 0x1d0   : > { %v1942_v20 = vpop.f32.mrb[4].mxu0 }
 0x1d1   : > { %v663_v21 = vpop.f32.mrb[5].mxu0 }
 0x1d2   : > { %v1943_v22 = vpop.f32.mrb[6].mxu0 }
 0x1d3   : > { %v986_v23 = vpack.c.bf16 %v1943_v22, %v1942_v20  ;;  %v666_v24 = vpop.f32.mrb[7].mxu0 }
 0x1d4   : > { %v985_v25 = vpack.c.bf16 %v666_v24, %v663_v21 }
 0x1d6   : > { %1130 = vmatmul.mubr.bf16.gmra.mrb[4].mxu1 %v984_v17 }
 0x1d7   : > { %1139 = vmatprep.mubr.bf16.mxu1 %v2428_v10 }
 0x1d8   : > { %v1946_v26 = vpop.f32.mrb[8].mxu0 }
 0x1d9   : > { %v679_v27 = vpop.f32.mrb[9].mxu0 }
 0x1da   : > { %v1947_v28 = vpop.f32.mrb[10].mxu0 }
 0x1db   : > { %v988_v29 = vpack.c.bf16 %v1947_v28, %v1946_v26  ;;  %v682_v30 = vpop.f32.mrb[11].mxu0 }
 0x1dc   : > { %v987_v31 = vpack.c.bf16 %v682_v30, %v679_v27 }
 0x1de   : > { %1140 = vmatmul.mubr.bf16.gmra.mrb[8].mxu1 %v985_v25 }
 0x1df   : > { %1149 = vmatprep.mubr.bf16.mxu1 %v2428_v10 }
 0x1e0   : > { %v1950_v32 = vpop.f32.mrb[12].mxu0 }
 0x1e1   : > { %v695_v33 = vpop.f32.mrb[13].mxu0 }
 0x1e2   : > { %v1951_v34 = vpop.f32.mrb[14].mxu0 }
 0x1e3   : > { %v990_v35 = vpack.c.bf16 %v1951_v34, %v1950_v32  ;;  %v698_v36 = vpop.f32.mrb[15].mxu0 }
 0x1e4   : > { %v989_v37 = vpack.c.bf16 %v698_v36, %v695_v33 }
 0x1e6   : > { %1150 = vmatmul.mubr.bf16.gmra.mrb[12].mxu1 %v986_v23 }
 0x1e7   : > { %1159 = vmatprep.mubr.bf16.mxu1 %v2428_v10 }
 0x1ee   : > { %1160 = vmatmul.mubr.bf16.gmra.mrb[16].mxu1 %v987_v31 }
 0x1ef   : > { %1169 = vmatprep.mubr.bf16.mxu1 %v2428_v10 }
 0x1f6   : > { %1170 = vmatmul.mubr.bf16.gmra.mrb[20].mxu1 %v988_v29 }
 0x1f7   : > { %1179 = vmatprep.mubr.bf16.mxu1 %v2428_v10 }
 0x1fe   : > { %1180 = vmatmul.mubr.bf16.gmra.mrb[24].mxu1 %v989_v37 }
 0x1ff   : > { %1189 = vmatprep.mubr.bf16.mxu1 %v2428_v10 }
 0x206   : > { %1190 = vmatmul.mubr.bf16.gmra.mrb[28].mxu1 %v990_v35 }
 0x2a1   : > { %v1121_v49 = vpop.f32.mrb[0].mxu1 }
 0x2a2   : > { %v1212_v10 = vadd.f32 %v2852_v47, %v1121_v49  ;;  %v1123_v50 = vpop.f32.mrb[1].mxu1 }
 0x2a3   : > { %v1213_v51 = vadd.f32 %v2854_v48, %v1123_v50  ;;  %v1125_v52 = vpop.f32.mrb[2].mxu1 }
 0x2a4   : > { %v1214_v53 = vadd.f32 %v2852_v47, %v1125_v52  ;;  %v1127_v54 = vpop.f32.mrb[3].mxu1  ;;  %v1244_v56 = vmax.f32 %v1212_v10, 0.0 }
 0x2a5   : > { %v1215_v55 = vadd.f32 %v2854_v48, %v1127_v54  ;;  %v1245_v58 = vmax.f32 %v1213_v51, 0.0 }
 0x2a6   : > { %v1246_v57 = vmax.f32 %v1214_v53, 0.0 }
 0x2a7   : > { %v1247_v59 = vmax.f32 %v1215_v55, 0.0 }
 0x2a8   : > { %v1276_v60 = vpack.c.bf16 %v1246_v57, %v1244_v56 }
 0x2a9   : > { %v1277_v61 = vpack.c.bf16 %v1247_v59, %v1245_v58  ;;  %v1131_v62 = vpop.f32.mrb[4].mxu1 }
 0x2aa   : > { %v1216_v63 = vadd.f32 %v2852_v47, %v1131_v62  ;;  %v1133_v0 = vpop.f32.mrb[5].mxu1 }
 0x2ab   : > { %v1217_v1 = vadd.f32 %v2854_v48, %v1133_v0  ;;  %v1135_v2 = vpop.f32.mrb[6].mxu1  ;;  %1459 = vmatprep.mubr.bf16.mxu0 %v1277_v61 }
 0x2ac   : > { %v1218_v3 = vadd.f32 %v2852_v47, %v1135_v2  ;;  %v1137_v4 = vpop.f32.mrb[7].mxu1  ;;  %1460 = vmatmul.mubr.bf16.vlgmr.msra.gmra.mrb[16].mxu0 %v1276_v60  ;;  %v1248_v6 = vmax.f32 %v1216_v63, 0.0 }
 0x2ad   : > { %v1219_v5 = vadd.f32 %v2854_v48, %v1137_v4  ;;  %v1249_v8 = vmax.f32 %v1217_v1, 0.0 }
 0x2ae   : > { %v1250_v7 = vmax.f32 %v1218_v3, 0.0 }
 0x2af   : > { %v1251_v9 = vmax.f32 %v1219_v5, 0.0 }
 0x2b0   : > { %v1278_v11 = vpack.c.bf16 %v1250_v7, %v1248_v6 }
 0x2b1   : > { %v1279_v12 = vpack.c.bf16 %v1251_v9, %v1249_v8  ;;  %v1141_v13 = vpop.f32.mrb[8].mxu1 }
 0x2b2   : > { %v1220_v14 = vadd.f32 %v2852_v47, %v1141_v13  ;;  %v1143_v15 = vpop.f32.mrb[9].mxu1 }
 0x2b3   : > { %v1221_v16 = vadd.f32 %v2854_v48, %v1143_v15  ;;  %v1145_v17 = vpop.f32.mrb[10].mxu1  ;;  %1467 = vmatprep.mubr.bf16.mxu0 %v1279_v12 }
 0x2b4   : > { %v1222_v18 = vadd.f32 %v2852_v47, %v1145_v17  ;;  %v1147_v19 = vpop.f32.mrb[11].mxu1  ;;  %1468 = vmatmul.mubr.bf16.gmra.mrb[20].mxu0 %v1278_v11  ;;  %v1252_v21 = vmax.f32 %v1220_v14, 0.0 }
 0x2b5   : > { %v1223_v20 = vadd.f32 %v2854_v48, %v1147_v19  ;;  %v1253_v23 = vmax.f32 %v1221_v16, 0.0 }
 0x2b6   : > { %v1254_v22 = vmax.f32 %v1222_v18, 0.0 }
 0x2b7   : > { %v1255_v24 = vmax.f32 %v1223_v20, 0.0 }
 0x2b8   : > { %v1280_v25 = vpack.c.bf16 %v1254_v22, %v1252_v21 }
 0x2b9   : > { %v1281_v26 = vpack.c.bf16 %v1255_v24, %v1253_v23  ;;  %v1151_v27 = vpop.f32.mrb[12].mxu1 }
 0x2ba   : > { %v1224_v28 = vadd.f32 %v2852_v47, %v1151_v27  ;;  %v1153_v29 = vpop.f32.mrb[13].mxu1 }
 0x2bb   : > { %v1225_v30 = vadd.f32 %v2854_v48, %v1153_v29  ;;  %v1155_v31 = vpop.f32.mrb[14].mxu1  ;;  %1475 = vmatprep.mubr.bf16.mxu0 %v1281_v26 }
 0x2bc   : > { %v1226_v32 = vadd.f32 %v2852_v47, %v1155_v31  ;;  %v1157_v33 = vpop.f32.mrb[15].mxu1  ;;  %1476 = vmatmul.mubr.bf16.gmra.mrb[24].mxu0 %v1280_v25  ;;  %v1256_v35 = vmax.f32 %v1224_v28, 0.0 }
 0x2bd   : > { %v1227_v34 = vadd.f32 %v2854_v48, %v1157_v33  ;;  %v1257_v37 = vmax.f32 %v1225_v30, 0.0 }
 0x2be   : > { %v1258_v36 = vmax.f32 %v1226_v32, 0.0 }
 0x2bf   : > { %v1259_v38 = vmax.f32 %v1227_v34, 0.0 }
 0x2c0   : > { %v1282_v39 = vpack.c.bf16 %v1258_v36, %v1256_v35  ;;  %v2893_v36 = vld [vmem:[%s463_s5] ss:$0 sm:$0xff] }
 0x2c1   : > { %v1283_v40 = vpack.c.bf16 %v1259_v38, %v1257_v37  ;;  %v1161_v41 = vpop.f32.mrb[16].mxu1 }
 0x2c2   : > { %v1228_v42 = vadd.f32 %v2852_v47, %v1161_v41  ;;  %v1163_v43 = vpop.f32.mrb[17].mxu1 }
 0x2c3   : > { %v1229_v44 = vadd.f32 %v2854_v48, %v1163_v43  ;;  %v1165_v45 = vpop.f32.mrb[18].mxu1  ;;  %1483 = vmatprep.mubr.bf16.mxu0 %v1283_v40 }
 0x2c4   : > { %v1230_v46 = vadd.f32 %v2852_v47, %v1165_v45  ;;  %v1167_v49 = vpop.f32.mrb[19].mxu1  ;;  %1484 = vmatmul.mubr.bf16.gmra.mrb[28].mxu0 %v1282_v39  ;;  %v1260_v50 = vmax.f32 %v1228_v42, 0.0 }
 0x2c5   : > { %v1231_v10 = vadd.f32 %v2854_v48, %v1167_v49  ;;  %v1261_v52 = vmax.f32 %v1229_v44, 0.0 }
 0x2c6   : > { %v1262_v51 = vmax.f32 %v1230_v46, 0.0 }
 0x2c7   : > { %v1263_v53 = vmax.f32 %v1231_v10, 0.0 }
 0x2c8   : > { %v1284_v54 = vpack.c.bf16 %v1262_v51, %v1260_v50 }
 0x2c9   : > { %v1285_v55 = vpack.c.bf16 %v1263_v53, %v1261_v52  ;;  %v1171_v56 = vpop.f32.mrb[20].mxu1 }
 0x2ca   : > { %v1232_v57 = vadd.f32 %v2852_v47, %v1171_v56  ;;  %v1173_v58 = vpop.f32.mrb[21].mxu1 }
 0x2cb   : > { %v1233_v59 = vadd.f32 %v2854_v48, %v1173_v58  ;;  %v1175_v60 = vpop.f32.mrb[22].mxu1  ;;  %1491 = vmatprep.mubr.bf16.mxu0 %v1285_v55 }
 0x2cc   : > { %v1234_v61 = vadd.f32 %v2852_v47, %v1175_v60  ;;  %v1177_v62 = vpop.f32.mrb[23].mxu1  ;;  %1492 = vmatmul.mubr.bf16.gmra.mrb[32].mxu0 %v1284_v54  ;;  %v1264_v0 = vmax.f32 %v1232_v57, 0.0 }
 0x2cd   : > { %v1235_v63 = vadd.f32 %v2854_v48, %v1177_v62  ;;  %v1265_v2 = vmax.f32 %v1233_v59, 0.0 }
 0x2ce   : > { %v1266_v1 = vmax.f32 %v1234_v61, 0.0 }
 0x2cf   : > { %v1267_v3 = vmax.f32 %v1235_v63, 0.0 }
 0x2d0   : > { %v1286_v4 = vpack.c.bf16 %v1266_v1, %v1264_v0 }
 0x2d1   : > { %v1287_v5 = vpack.c.bf16 %v1267_v3, %v1265_v2  ;;  %v1181_v6 = vpop.f32.mrb[24].mxu1 }
 0x2d2   : > { %v1236_v7 = vadd.f32 %v2852_v47, %v1181_v6  ;;  %v1183_v8 = vpop.f32.mrb[25].mxu1 }
 0x2d3   : > { %v1237_v9 = vadd.f32 %v2854_v48, %v1183_v8  ;;  %v1185_v11 = vpop.f32.mrb[26].mxu1  ;;  %1499 = vmatprep.mubr.bf16.mxu0 %v1287_v5 }
 0x2d4   : > { %v1238_v12 = vadd.f32 %v2852_v47, %v1185_v11  ;;  %v1187_v13 = vpop.f32.mrb[27].mxu1  ;;  %1500 = vmatmul.mubr.bf16.gmra.mrb[36].mxu0 %v1286_v4  ;;  %v1268_v15 = vmax.f32 %v1236_v7, 0.0 }
 0x2d5   : > { %v1239_v14 = vadd.f32 %v2854_v48, %v1187_v13  ;;  %v1269_v17 = vmax.f32 %v1237_v9, 0.0 }
 0x2d6   : > { %v1270_v16 = vmax.f32 %v1238_v12, 0.0 }
 0x2d7   : > { %v1271_v18 = vmax.f32 %v1239_v14, 0.0 }
 0x2d8   : > { %v1288_v19 = vpack.c.bf16 %v1270_v16, %v1268_v15 }
 0x2d9   : > { %v1289_v20 = vpack.c.bf16 %v1271_v18, %v1269_v17  ;;  %v1191_v21 = vpop.f32.mrb[28].mxu1 }
 0x2da   : > { %v1240_v22 = vadd.f32 %v2852_v47, %v1191_v21  ;;  %v1193_v23 = vpop.f32.mrb[29].mxu1 }
 0x2db   : > { %v1241_v24 = vadd.f32 %v2854_v48, %v1193_v23  ;;  %v1195_v25 = vpop.f32.mrb[30].mxu1  ;;  %1507 = vmatprep.mubr.bf16.mxu0 %v1289_v20 }
 0x2dc   : > { %v1242_v26 = vadd.f32 %v2852_v47, %v1195_v25  ;;  %v1197_v27 = vpop.f32.mrb[31].mxu1  ;;  %1508 = vmatmul.mubr.bf16.gmra.mrb[40].mxu0 %v1288_v19  ;;  %v1272_v29 = vmax.f32 %v1240_v22, 0.0 }
 0x2dd   : > { %v1243_v28 = vadd.f32 %v2854_v48, %v1197_v27  ;;  %v1273_v31 = vmax.f32 %v1241_v24, 0.0 }
 0x2de   : > { %v1274_v30 = vmax.f32 %v1242_v26, 0.0 }
 0x2df   : > { %v1275_v32 = vmax.f32 %v1243_v28, 0.0 }
 0x2e0   : > { %v1290_v33 = vpack.c.bf16 %v1274_v30, %v1272_v29 }
 0x2e1   : > { %v1291_v34 = vpack.c.bf16 %v1275_v32, %v1273_v31 }
 0x2e3   : > { %1515 = vmatprep.mubr.bf16.mxu0 %v1291_v34 }
 0x2e4   : > { %1516 = vmatmul.mubr.bf16.gmra.mrb[44].mxu0 %v1290_v33 }
 0x37f   : > { %v1872_v35 = vpop.f32.mrb[16].mxu0 }
 0x380   : > { %v1873_v47 = vpop.f32.mrb[17].mxu0 }
 0x381   : > { %v1874_v37 = vadd.f32 %v1873_v47, %v1872_v35  ;;  %v1875_v38 = vpop.f32.mrb[18].mxu0 }
 0x382   : > { %v1876_v39 = vpop.f32.mrb[19].mxu0 }
 0x383   : > { %v2896_v48 = vadd.f32 %v1874_v37, %v2893_v36  ;;  %v1877_v40 = vadd.f32 %v1876_v39, %v1875_v38 }
 0x385   : > { %v2899_v41 = vadd.f32 %v1877_v40, %v2893_v36  ;;  %1528 = vst [vmem:[#allocation14] sm:$0xff] (!%p1831_p8), %v2896_v48 }
 0x387   : > { %v1878_v42 = vpop.f32.mrb[20].mxu0  ;;  %1529 = vst [vmem:[#allocation14 + $0x8] sm:$0xff] (!%p1831_p8), %v2899_v41 }
 0x388   : > { %v1879_v43 = vpop.f32.mrb[21].mxu0 }
 0x389   : > { %v1880_v44 = vadd.f32 %v1879_v43, %v1878_v42  ;;  %v1881_v45 = vpop.f32.mrb[22].mxu0 }
 0x38a   : > { %v1882_v46 = vpop.f32.mrb[23].mxu0 }
 0x38b   : > { %v2902_v49 = vadd.f32 %v1880_v44, %v2893_v36  ;;  %v1883_v10 = vadd.f32 %v1882_v46, %v1881_v45 }
 0x38d   : > { %v2905_v50 = vadd.f32 %v1883_v10, %v2893_v36  ;;  %1530 = vst [vmem:[#allocation14 + $0x10] sm:$0xff] (!%p1831_p8), %v2902_v49 }
 0x38f   : > { %v1884_v51 = vpop.f32.mrb[24].mxu0  ;;  %1531 = vst [vmem:[#allocation14 + $0x18] sm:$0xff] (!%p1831_p8), %v2905_v50 }
 0x390   : > { %v1885_v52 = vpop.f32.mrb[25].mxu0 }
 0x391   : > { %v1886_v53 = vadd.f32 %v1885_v52, %v1884_v51  ;;  %v1887_v54 = vpop.f32.mrb[26].mxu0 }
 0x392   : > { %v1888_v55 = vpop.f32.mrb[27].mxu0 }
 0x393   : > { %v2908_v56 = vadd.f32 %v1886_v53, %v2893_v36  ;;  %v1889_v57 = vadd.f32 %v1888_v55, %v1887_v54 }
 0x395   : > { %v2911_v58 = vadd.f32 %v1889_v57, %v2893_v36  ;;  %1532 = vst [vmem:[#allocation14 + $0x20] sm:$0xff] (!%p1831_p8), %v2908_v56 }
 0x397   : > { %v1890_v59 = vpop.f32.mrb[28].mxu0  ;;  %1533 = vst [vmem:[#allocation14 + $0x28] sm:$0xff] (!%p1831_p8), %v2911_v58 }
 0x398   : > { %v1891_v60 = vpop.f32.mrb[29].mxu0 }
 0x399   : > { %v1892_v61 = vadd.f32 %v1891_v60, %v1890_v59  ;;  %v1893_v62 = vpop.f32.mrb[30].mxu0 }
 0x39a   : > { %v1894_v63 = vpop.f32.mrb[31].mxu0 }
 0x39b   : > { %v2914_v0 = vadd.f32 %v1892_v61, %v2893_v36  ;;  %v1895_v1 = vadd.f32 %v1894_v63, %v1893_v62 }
 0x39d   : > { %v2917_v2 = vadd.f32 %v1895_v1, %v2893_v36  ;;  %1534 = vst [vmem:[#allocation14 + $0x30] sm:$0xff] (!%p1831_p8), %v2914_v0 }
 0x39f   : > { %v1896_v3 = vpop.f32.mrb[32].mxu0  ;;  %1535 = vst [vmem:[#allocation14 + $0x38] sm:$0xff] (!%p1831_p8), %v2917_v2 }
 0x3a0   : > { %v1897_v4 = vpop.f32.mrb[33].mxu0 }
 0x3a1   : > { %v1898_v5 = vadd.f32 %v1897_v4, %v1896_v3  ;;  %v1899_v6 = vpop.f32.mrb[34].mxu0 }
 0x3a2   : > { %v1900_v7 = vpop.f32.mrb[35].mxu0 }
 0x3a3   : > { %v2920_v8 = vadd.f32 %v1898_v5, %v2893_v36  ;;  %v1901_v9 = vadd.f32 %v1900_v7, %v1899_v6 }
 0x3a5   : > { %v2923_v11 = vadd.f32 %v1901_v9, %v2893_v36  ;;  %1536 = vst [vmem:[#allocation14 + $0x40] sm:$0xff] (!%p1831_p8), %v2920_v8 }
 0x3a7   : > { %v1902_v12 = vpop.f32.mrb[36].mxu0  ;;  %1537 = vst [vmem:[#allocation14 + $0x48] sm:$0xff] (!%p1831_p8), %v2923_v11 }
 0x3a8   : > { %v1903_v13 = vpop.f32.mrb[37].mxu0 }
 0x3a9   : > { %v1904_v14 = vadd.f32 %v1903_v13, %v1902_v12  ;;  %v1905_v15 = vpop.f32.mrb[38].mxu0 }
 0x3aa   : > { %v1906_v16 = vpop.f32.mrb[39].mxu0 }
 0x3ab   : > { %v2926_v17 = vadd.f32 %v1904_v14, %v2893_v36  ;;  %v1907_v18 = vadd.f32 %v1906_v16, %v1905_v15 }
 0x3ad   : > { %v2929_v19 = vadd.f32 %v1907_v18, %v2893_v36  ;;  %1538 = vst [vmem:[#allocation14 + $0x50] sm:$0xff] (!%p1831_p8), %v2926_v17 }
 0x3af   : > { %v1908_v20 = vpop.f32.mrb[40].mxu0  ;;  %1539 = vst [vmem:[#allocation14 + $0x58] sm:$0xff] (!%p1831_p8), %v2929_v19 }
 0x3b0   : > { %v1909_v21 = vpop.f32.mrb[41].mxu0 }
 0x3b1   : > { %v1910_v22 = vadd.f32 %v1909_v21, %v1908_v20  ;;  %v1911_v23 = vpop.f32.mrb[42].mxu0 }
 0x3b2   : > { %v1912_v24 = vpop.f32.mrb[43].mxu0 }
 0x3b3   : > { %v1510_v25 = vadd.f32 %v1910_v22, %v2893_v36  ;;  %v1913_v26 = vadd.f32 %v1912_v24, %v1911_v23 }
 0x3b5   : > { %v1513_v27 = vadd.f32 %v1913_v26, %v2893_v36  ;;  %1540 = vst [vmem:[#allocation14 + $0x60] sm:$0xff] (!%p1831_p8), %v1510_v25 }
 0x3b7   : > { %v1914_v28 = vpop.f32.mrb[44].mxu0  ;;  %1527 = sbr.rel (%p1831_p8) target bundleno = 960 (0x3c0), region = 84  ;;  %1541 = vst [vmem:[#allocation14 + $0x68] sm:$0xff] (!%p1831_p8), %v1513_v27 }
 0x3b8   : > { %v1915_v29 = vpop.f32.mrb[45].mxu0 }
 0x3b9   : > { %v1916_v30 = vadd.f32 %v1915_v29, %v1914_v28  ;;  %v1917_v31 = vpop.f32.mrb[46].mxu0 }
 0x3ba   : > { %v1918_v32 = vpop.f32.mrb[47].mxu0 }
 0x3bb   : > { %v1518_v33 = vadd.f32 %v1916_v30, %v2893_v36  ;;  %v1919_v34 = vadd.f32 %v1918_v32, %v1917_v31 }
 0x3bd   : > { %v1521_v35 = vadd.f32 %v1919_v34, %v2893_v36  ;;  %1542 = vst [vmem:[#allocation14 + $0x70] sm:$0xff] (!%p1831_p8), %v1518_v33 }
 0x3bf   : > { %1543 = vst [vmem:[#allocation14 + $0x78] sm:$0xff] %v1521_v35 }
 0x3c0 PF: > { %p1832_p12 = scmp.ge.s32.totalorder %s2496_s9, 2 }
 0x3c1   : > { %v1548_v36 = vmax.f32 (!%p1832_p12), %v2896_v48, 0.0  ;;  %v1549_v47 = vmax.f32 (!%p1832_p12), %v2899_v41, 0.0  ;;  %v1550_v37 = vmax.f32 (!%p1832_p12), %v2902_v49, 0.0  ;;  %v1551_v38 = vmax.f32 (!%p1832_p12), %v2905_v50, 0.0 }
 0x3c2   : > { %1547 = sbr.rel (%p1832_p12) target bundleno = 971 (0x3cb), region = 88  ;;  %v1552_v39 = vmax.f32 (!%p1832_p12), %v2908_v56, 0.0  ;;  %v1553_v40 = vmax.f32 (!%p1832_p12), %v2911_v58, 0.0  ;;  %v1554_v42 = vmax.f32 (!%p1832_p12), %v2914_v0, 0.0  ;;  %v1555_v43 = vmax.f32 (!%p1832_p12), %v2917_v2, 0.0 }
 0x3c3   : > { %v1564_v44 = vpack.c.bf16 (!%p1832_p12), %v1549_v47, %v1548_v36  ;;  %v1565_v45 = vpack.c.bf16 (!%p1832_p12), %v1551_v38, %v1550_v37  ;;  %v1556_v46 = vmax.f32 (!%p1832_p12), %v2920_v8, 0.0  ;;  %v1557_v48 = vmax.f32 (!%p1832_p12), %v2923_v11, 0.0 }
 0x3c4   : > { %v1566_v10 = vpack.c.bf16 (!%p1832_p12), %v1553_v40, %v1552_v39  ;;  %v1567_v41 = vpack.c.bf16 (!%p1832_p12), %v1555_v43, %v1554_v42  ;;  %v1558_v49 = vmax.f32 (!%p1832_p12), %v2926_v17, 0.0  ;;  %v1559_v50 = vmax.f32 (!%p1832_p12), %v2929_v19, 0.0 }
 0x3c5   : > { %1572 = vst [vmem:[#allocation2] sm:$0xff] (!%p1832_p12), %v1564_v44  ;;  %1573 = vst [vmem:[#allocation2 + $0x8] sm:$0xff] (!%p1832_p12), %v1565_v45  ;;  %v1568_v51 = vpack.c.bf16 (!%p1832_p12), %v1557_v48, %v1556_v46  ;;  %v1560_v52 = vmax.f32 (!%p1832_p12), %v1510_v25, 0.0  ;;  %v1561_v53 = vmax.f32 (!%p1832_p12), %v1513_v27, 0.0  ;;  %v1562_v54 = vmax.f32 (!%p1832_p12), %v1518_v33, 0.0 }
 0x3c6   : > { %1574 = vst [vmem:[#allocation2 + $0x10] sm:$0xff] (!%p1832_p12), %v1566_v10  ;;  %1575 = vst [vmem:[#allocation2 + $0x18] sm:$0xff] (!%p1832_p12), %v1567_v41  ;;  %v1569_v55 = vpack.c.bf16 (!%p1832_p12), %v1559_v50, %v1558_v49  ;;  %v1563_v56 = vmax.f32 (!%p1832_p12), %v1521_v35, 0.0 }
 0x3c7   : > { %1576 = vst [vmem:[#allocation2 + $0x20] sm:$0xff] (!%p1832_p12), %v1568_v51  ;;  %v1570_v57 = vpack.c.bf16 (!%p1832_p12), %v1561_v53, %v1560_v52 }
 0x3c8   : > { %1577 = vst [vmem:[#allocation2 + $0x28] sm:$0xff] (!%p1832_p12), %v1569_v55  ;;  %v1571_v58 = vpack.c.bf16 (!%p1832_p12), %v1563_v56, %v1562_v54 }
 0x3c9   : > { %1578 = vst [vmem:[#allocation2 + $0x30] sm:$0xff] %v1570_v57 }
 0x3ca   : > { %1579 = vst [vmem:[#allocation2 + $0x38] sm:$0xff] %v1571_v58 }
 0x3cb PF: > { %p2033_p7 = scmp.eq.s32.totalorder %s2496_s9, 2  ;;  %s2429_s26 = smov [#allocation14]  }
 0x3cc   : > { %s1586_s27 = sshll.u32 %s2429_s26, 4  ;;  %s1587_s27 = int_to_ptr.vmem [resolvable:$true] %s1586_s27 }
 0x3cd   : > { %s2340_s22 = scalar_lea.vmem %s1587_s27, 2048  ;;  %p2347_p10 = scmp.lt.s32.totalorder %s1587_s27, %s1587_s27 }
 0x3ce   : > { %p2341_p11 = scmp.ne.s32.totalorder %s1587_s27, %s2340_s22  ;;  %p2348_p4 = scmp.lt.s32.totalorder %s2340_s22, %s2340_s22 }
 0x3d0   : > { %p2342_p5 = pnand %p2341_p11, %p2033_p7  ;;  %p2349_p13 = por %p2348_p4, %p2347_p10 }
 0x3d2   : > { %p2343_p9 = pneg %p2342_p5 }
 0x3d4   : > { %p2350_p2 = pnand %p2349_p13, %p2343_p9 }
 0x3d6   : > { %2353 = shalt.err (!%p2350_p2)
}
 0x3d7   : > { %s3056_s12 = sld [smem:[#allocation25_spill]] }
 0x3dd   : > { %s2354_s1 = scalar_lea.hbm %s3056_s12, 2048 }
 0x3de   : > { %p2355_p3 = scmp.ne.s32.totalorder %s3056_s12, %s2354_s1  ;;  %p2360_p1 = scmp.lt.u32.totalorder %s2354_s1, %s3056_s12 }
 0x3e0   : > { %p2356_p6 = pnand %p2355_p3, %p2033_p7 }
 0x3e2   : > { %p2357_p0 = pneg %p2356_p6 }
 0x3e4   : > { %p2362_p8 = pnand %p2360_p1, %p2357_p0 }
 0x3e6   : > { %2365 = shalt.err (!%p2362_p8)
}
 0x3e7   : > { %s2430_s10 = smov 128   ;;  %s2431_s8 = smov 8  }
 0x3e8   : > { %2003 = dma.vmem_to_hbm [thread:$0]  (%p2033_p7), %s1587_s27, 2048, %s3056_s12, [#allocation5], %s2430_s10, %s2430_s10, %s2431_s8  }
 0x3e9   : > { %2399 = dma.done.wait (%p2033_p7), [#allocation5], 2048  }
 0x3ea   : > { %2401 = vsyncadd (%p2033_p7), [#allocation5], 4294965248 }
 0x3eb PF: > { %s3057_s30 = sld [smem:[#allocation20_spill]]  ;;  %s3058_s25 = sld [smem:[#allocation21_spill]] }
 0x3ec   : > { %s3059_s27 = smov %s2408_s28  ;;  %s3060_s28 = smov %s2412_s29 }
 0x3f1   : > { %p24_p12 = scmp.ge.s32.totalorder %s3057_s30, 5   ;;  %s3061_s29 = smov %s3058_s25 }
 0x3f3   :  { %26 = sbr.rel (!%p24_p12) target bundleno = 13 (0xd), region = 144 }
 0x3fa   :  { %1602 = vsyncpa [#allocation4], 1 }
 0x3fb   :  { %1604 = vsyncpa [#allocation4 + $0x1], 1 }
 0x3fc   :  { %1605 = vsyncpa [#allocation7], 1 }
 0x3fd   :  { %1606 = vsyncpa [#allocation10], 1 }
 0x3fe   :  { %1608 = vsyncpa [#allocation10 + $0x1], 1 }
 0x3ff   :  { %1609 = vsyncpa [#allocation13], 1 }
 0x400   :  { %1611 = vsyncpa [#allocation13 + $0x1], 1 }
 0x401   :  { %1612 = vsyncpa [#allocation5], 1 }
 0x402   :  { %1614 = vsyncpa [#allocation5 + $0x1], 1 }

</bundles_post_ra>
